<compile_context>
chip_gen: v7x
topology: tpu7x:2x2x1
jax: 0.10.0
libtpu: 0.0.40
codegen_flags: <defaults>
</compile_context>

<pallas_src>
import jax
import jax.numpy as jnp
from jax.experimental import pallas as pl
from jax.experimental.pallas import tpu as pltpu

EPS = 1e-5  # PyTorch nn.LayerNorm default


def _round_up(x, m):
    return (x + m - 1) // m * m


def _make_kernel(d_true, d_pad, tn):
    """Kernel closure over static sizes (true feature dim, padded dim, N tile)."""
    inv_d = 1.0 / float(d_true)

    def kernel(x_ref, gamma_ref, beta_ref, w_ref, b_ref, o_ref, h_ref):
        j = pl.program_id(1)

        # --- LayerNorm once per row tile (j == 0); cache bf16 result in VMEM ---
        @pl.when(j == 0)
        def _():
            x = x_ref[...].astype(jnp.float32)
            if d_true != d_pad:
                # Mask out zero-padded feature columns so mean/var use true D.
                mask = jax.lax.broadcasted_iota(jnp.int32, x.shape, 1) < d_true
                x = jnp.where(mask, x, 0.0)
            mean = jnp.sum(x, axis=-1, keepdims=True) * inv_d
            centered = x - mean
            if d_true != d_pad:
                centered = jnp.where(mask, centered, 0.0)
            var = jnp.sum(centered * centered, axis=-1, keepdims=True) * inv_d
            xn = centered * jax.lax.rsqrt(var + EPS)
            h = xn * gamma_ref[...] + beta_ref[...]
            h_ref[...] = h.astype(h_ref.dtype)

        # --- sub_layer: Linear on the MXU (bf16 inputs, f32 accumulation) ---
        y = jnp.dot(h_ref[...], w_ref[...], preferred_element_type=jnp.float32)
        y = y + b_ref[...].astype(jnp.float32)

        # --- dropout(p=0) is identity; residual add in f32 ---
        # TODO(synk): dr_rate > 0 would need pltpu.prng_seed/prng_random_bits masking.
        if tn == d_pad:
            x_cols = x_ref[...].astype(jnp.float32)
        else:
            col0 = pl.multiple_of(j * tn, 128)
            x_cols = x_ref[:, pl.ds(col0, tn)].astype(jnp.float32)

        o_ref[...] = (y + x_cols).astype(o_ref.dtype)

    return kernel


def residual_connection_layer(x, gamma, beta, w, b, *, dr_rate=0.0,
                              tm_target=512,
                              vmem_budget_bytes=32 * 1024 * 1024):
    """x: (B, S, D). Returns dropout(Linear(LayerNorm(x))) + x with dropout p=0."""
    assert dr_rate == 0.0, "only the dropout(p=0) inference path is implemented"
    B, S, D = x.shape
    rows = B * S

    # Lane-dense feature dim (multiple of 128).
    d_pad = _round_up(D, 128)

    # N tile: keep the whole output dim unless it is large (bounds W's VMEM
    # footprint independently of d_model -- matters on v7x's 64 MiB VMEM).
    tn = d_pad
    if d_pad > 2048:
        for cand in (2048, 1024, 512, 256, 128):
            if d_pad % cand == 0:
                tn = cand
                break
    n_j = d_pad // tn

    x_bytes = jnp.dtype(x.dtype).itemsize

    def vmem_estimate(tm_):
        w_bufs = 1 if n_j == 1 else 2
        return (2 * tm_ * d_pad * x_bytes        # x block (double buffered)
                + 2 * tm_ * tn * x_bytes         # out block (double buffered)
                + tm_ * d_pad * 2                # h scratch (bf16)
                + w_bufs * d_pad * tn * 2        # W (bf16)
                + w_bufs * tn * 4                # bias
                + 2 * d_pad * 4)                 # gamma + beta

    # Large row tile (amortizes ~0.35us/step grid overhead, feeds MXU M-dim),
    # shrunk until the pipeline fits the VMEM budget (safe on v5e/v6e/v7x).
    tm = min(tm_target, _round_up(rows, 8))
    while tm > 8 and vmem_estimate(tm) > vmem_budget_bytes:
        tm //= 2
    tm = max(_round_up(tm, 8), 8)
    rows_pad = _round_up(rows, tm)

    # Pad inputs: zero rows/cols are normalized harmlessly (masked) and sliced off.
    x2 = jnp.pad(x.reshape(rows, D), ((0, rows_pad - rows), (0, d_pad - D)))
    gamma2 = jnp.pad(gamma.astype(jnp.float32).reshape(1, D), ((0, 0), (0, d_pad - D)))
    beta2 = jnp.pad(beta.astype(jnp.float32).reshape(1, D), ((0, 0), (0, d_pad - D)))
    w2 = jnp.pad(w.astype(jnp.float32),
                 ((0, d_pad - D), (0, d_pad - D))).astype(jnp.bfloat16)
    b2 = jnp.pad(b.astype(jnp.float32).reshape(1, D), ((0, 0), (0, d_pad - D)))

    kernel = _make_kernel(D, d_pad, tn)

    cost = pl.CostEstimate(
        flops=2 * rows * D * D + 7 * rows * D,
        transcendentals=rows,                                   # rsqrt per row
        bytes_accessed=2 * rows * D * x_bytes + D * D * 2 + 3 * D * 4,
    )

    def _call(single_buffer_invariant):
        # Constant-index parameter blocks don't need double buffering.
        inv = {"pipeline_mode": pl.Buffered(1)} if single_buffer_invariant else {}
        w_kw = inv if n_j == 1 else {}
        return pl.pallas_call(
            kernel,
            out_shape=jax.ShapeDtypeStruct((rows_pad, d_pad), x.dtype),
            grid_spec=pltpu.PrefetchScalarGridSpec(
                num_scalar_prefetch=0,
                grid=(rows_pad // tm, n_j),
                in_specs=[
                    pl.BlockSpec((tm, d_pad), lambda i, j: (i, 0)),              # x rows
                    pl.BlockSpec((1, d_pad), lambda i, j: (0, 0), **inv),        # gamma
                    pl.BlockSpec((1, d_pad), lambda i, j: (0, 0), **inv),        # beta
                    pl.BlockSpec((d_pad, tn), lambda i, j: (0, j), **w_kw),      # W (bf16)
                    pl.BlockSpec((1, tn), lambda i, j: (0, j), **w_kw),          # bias
                ],
                out_specs=pl.BlockSpec((tm, tn), lambda i, j: (i, j)),
                scratch_shapes=[pltpu.VMEM((tm, d_pad), jnp.bfloat16)],          # cached norm(x)
            ),
            compiler_params=pltpu.CompilerParams(
                dimension_semantics=("parallel", "arbitrary"),
                vmem_limit_bytes=40 * 1024 * 1024,
            ),
            cost_estimate=cost,
        )(x2, gamma2, beta2, w2, b2)

    try:
        out = _call(True)
    except Exception:
        # TODO(synk): fallback for jax builds where BlockSpec pipeline_mode /
        # Buffered(1) is not supported by the top-level TPU pallas_call pipeline.
        out = _call(False)

    return out[:rows, :D].reshape(B, S, D)


def _reference(x, gamma, beta, w, b, *, bf16_matmul=True):
    xf = x.astype(jnp.float32)
    mean = jnp.mean(xf, axis=-1, keepdims=True)
    var = jnp.mean((xf - mean) ** 2, axis=-1, keepdims=True)
    h = (xf - mean) * jax.lax.rsqrt(var + EPS) * gamma + beta
    if bf16_matmul:
        y = jnp.dot(h.astype(jnp.bfloat16), w.astype(jnp.bfloat16),
                    preferred_element_type=jnp.float32)
    else:
        y = jnp.dot(h, w, preferred_element_type=jnp.float32)
    return y + b + xf


if __name__ == "__main__":
    B, S, D = 2, 8, 32  # batch=2, seq=8, hidden=32
    key = jax.random.PRNGKey(0)
    kx, kw, kb, kg, kbt = jax.random.split(key, 5)

    x = jax.random.normal(kx, (B, S, D), dtype=jnp.float32)
    gamma = 1.0 + 0.1 * jax.random.normal(kg, (D,), dtype=jnp.float32)
    beta = 0.1 * jax.random.normal(kbt, (D,), dtype=jnp.float32)
    w = jax.random.normal(kw, (D, D), dtype=jnp.float32) * (1.0 / jnp.sqrt(D))
    b = 0.01 * jax.random.normal(kb, (D,), dtype=jnp.float32)

    out = jax.block_until_ready(residual_connection_layer(x, gamma, beta, w, b))

    assert out.shape == (B, S, D)
    # Exact-path check (same bf16 cast pattern as the kernel) and a loose check
    # against the pure-f32 reference (bounds the bf16 matmul quantization error).
    ref_bf16 = _reference(x, gamma, beta, w, b, bf16_matmul=True)
    ref_f32 = _reference(x, gamma, beta, w, b, bf16_matmul=False)
    assert jnp.allclose(out, ref_bf16, atol=1e-3, rtol=1e-3), "mismatch vs bf16 reference"
    assert jnp.allclose(out, ref_f32, atol=5e-2, rtol=5e-2), "mismatch vs f32 reference"

    print("KERNEL_OK")
</pallas_src>

<mosaic_0001>
module attributes {stable_mosaic.version = 11 : i64} {
  func.func @kernel(%arg0: i32, %arg1: i32, %arg2: memref<16x128xf32, #tpu.memory_space<vmem>>, %arg3: memref<1x128xf32, #tpu.memory_space<vmem>>, %arg4: memref<1x128xf32, #tpu.memory_space<vmem>>, %arg5: memref<128x128xbf16, #tpu.memory_space<vmem>>, %arg6: memref<1x128xf32, #tpu.memory_space<vmem>>, %arg7: memref<16x128xf32, #tpu.memory_space<vmem>>, %arg8: memref<16x128xbf16, #tpu.memory_space<vmem>>) attributes {dimension_semantics = [#tpu.dimension_semantics<parallel>, #tpu.dimension_semantics<arbitrary>], iteration_bounds = array<i64: 1, 1>, scalar_prefetch = 0 : i64, scratch_operands = 1 : i64, tpu.core_type = #tpu.core_type<tc>, window_params = [{transform_indices = @transform_0, window_bounds = array<i64: 16, 128>}, {pipeline_mode = #tpu.pipeline_mode<synchronous>, transform_indices = @transform_1, window_bounds = array<i64: 1, 128>}, {pipeline_mode = #tpu.pipeline_mode<synchronous>, transform_indices = @transform_2, window_bounds = array<i64: 1, 128>}, {pipeline_mode = #tpu.pipeline_mode<synchronous>, transform_indices = @transform_3, window_bounds = array<i64: 128, 128>}, {pipeline_mode = #tpu.pipeline_mode<synchronous>, transform_indices = @transform_4, window_bounds = array<i64: 1, 128>}, {transform_indices = @transform_5, window_bounds = array<i64: 16, 128>}]} {
    %c0_i32 = arith.constant 0 : i32
    %0 = arith.cmpi eq, %arg1, %c0_i32 : i32
    %1 = arith.extui %0 : i1 to i32
    %c0_i32_0 = arith.constant 0 : i32
    %2 = arith.cmpi ne, %1, %c0_i32_0 : i32
    scf.if %2 {
      %c0_10 = arith.constant 0 : index
      %c0_11 = arith.constant 0 : index
      %12 = vector.load %arg2[%c0_10, %c0_11] : memref<16x128xf32, #tpu.memory_space<vmem>>, vector<16x128xf32>
      %13 = tpu.iota {dimensions = array<i32: 1>} : vector<16x128xi32>
      %c32_i32 = arith.constant 32 : i32
      %14 = vector.broadcast %c32_i32 : i32 to vector<16x128xi32>
      %15 = arith.cmpi slt, %13, %14 : vector<16x128xi32>
      %cst_12 = arith.constant 0.000000e+00 : f32
      %16 = vector.broadcast %cst_12 : f32 to vector<16x128xf32>
      %17 = arith.select %15, %12, %16 : vector<16x128xi1>, vector<16x128xf32>
      %cst_13 = arith.constant dense<0.000000e+00> : vector<16xf32>
      %18 = vector.multi_reduction <add>, %17, %cst_13 [1] : vector<16x128xf32> to vector<16xf32>
      %19 = vector.shape_cast %18 : vector<16xf32> to vector<16x1xf32>
      %cst_14 = arith.constant 3.125000e-02 : f32
      %20 = vector.broadcast %cst_14 : f32 to vector<16x1xf32>
      %21 = arith.mulf %19, %20 : vector<16x1xf32>
      %22 = vector.broadcast %21 : vector<16x1xf32> to vector<16x128xf32>
      %23 = arith.subf %17, %22 : vector<16x128xf32>
      %cst_15 = arith.constant 0.000000e+00 : f32
      %24 = vector.broadcast %cst_15 : f32 to vector<16x128xf32>
      %25 = arith.select %15, %23, %24 : vector<16x128xi1>, vector<16x128xf32>
      %26 = arith.mulf %25, %25 : vector<16x128xf32>
      %cst_16 = arith.constant dense<0.000000e+00> : vector<16xf32>
      %27 = vector.multi_reduction <add>, %26, %cst_16 [1] : vector<16x128xf32> to vector<16xf32>
      %28 = vector.shape_cast %27 : vector<16xf32> to vector<16x1xf32>
      %cst_17 = arith.constant 3.125000e-02 : f32
      %29 = vector.broadcast %cst_17 : f32 to vector<16x1xf32>
      %30 = arith.mulf %28, %29 : vector<16x1xf32>
      %cst_18 = arith.constant 9.99999974E-6 : f32
      %31 = vector.broadcast %cst_18 : f32 to vector<16x1xf32>
      %32 = arith.addf %30, %31 : vector<16x1xf32>
      %33 = math.rsqrt %32 : vector<16x1xf32>
      %34 = vector.broadcast %33 : vector<16x1xf32> to vector<16x128xf32>
      %35 = arith.mulf %25, %34 : vector<16x128xf32>
      %c0_19 = arith.constant 0 : index
      %c0_20 = arith.constant 0 : index
      %36 = vector.load %arg3[%c0_19, %c0_20] : memref<1x128xf32, #tpu.memory_space<vmem>>, vector<1x128xf32>
      %37 = vector.broadcast %36 : vector<1x128xf32> to vector<16x128xf32>
      %38 = arith.mulf %35, %37 : vector<16x128xf32>
      %c0_21 = arith.constant 0 : index
      %c0_22 = arith.constant 0 : index
      %39 = vector.load %arg4[%c0_21, %c0_22] : memref<1x128xf32, #tpu.memory_space<vmem>>, vector<1x128xf32>
      %40 = vector.broadcast %39 : vector<1x128xf32> to vector<16x128xf32>
      %41 = arith.addf %38, %40 : vector<16x128xf32>
      %42 = arith.truncf %41 : vector<16x128xf32> to vector<16x128xbf16>
      %c0_23 = arith.constant 0 : index
      %c0_24 = arith.constant 0 : index
      %43 = vector.load %arg8[%c0_23, %c0_24] : memref<16x128xbf16, #tpu.memory_space<vmem>>, vector<16x128xbf16>
      tpu.vector_store %arg8[%c0_23, %c0_24], %42 {strides = array<i32>} : memref<16x128xbf16, #tpu.memory_space<vmem>>, vector<16x128xbf16>,
    } else {
    }
    %c0 = arith.constant 0 : index
    %c0_1 = arith.constant 0 : index
    %3 = vector.load %arg8[%c0, %c0_1] : memref<16x128xbf16, #tpu.memory_space<vmem>>, vector<16x128xbf16>
    %c0_2 = arith.constant 0 : index
    %c0_3 = arith.constant 0 : index
    %4 = vector.load %arg5[%c0_2, %c0_3] : memref<128x128xbf16, #tpu.memory_space<vmem>>, vector<128x128xbf16>
    %cst = arith.constant dense<0.000000e+00> : vector<16x128xf32>
    %5 = tpu.matmul %3, %4, %cst {dimension_numbers = #tpu.dot_dimension_numbers<[1], [0], [0], [1], [0, 0, 1, 1], [], []>} : vector<16x128xbf16>, vector<128x128xbf16>, vector<16x128xf32> -> vector<16x128xf32>
    %c0_4 = arith.constant 0 : index
    %c0_5 = arith.constant 0 : index
    %6 = vector.load %arg6[%c0_4, %c0_5] : memref<1x128xf32, #tpu.memory_space<vmem>>, vector<1x128xf32>
    %7 = vector.broadcast %6 : vector<1x128xf32> to vector<16x128xf32>
    %8 = arith.addf %5, %7 : vector<16x128xf32>
    %c0_6 = arith.constant 0 : index
    %c0_7 = arith.constant 0 : index
    %9 = vector.load %arg2[%c0_6, %c0_7] : memref<16x128xf32, #tpu.memory_space<vmem>>, vector<16x128xf32>
    %10 = arith.addf %8, %9 : vector<16x128xf32>
    %c0_8 = arith.constant 0 : index
    %c0_9 = arith.constant 0 : index
    %11 = vector.load %arg7[%c0_8, %c0_9] : memref<16x128xf32, #tpu.memory_space<vmem>>, vector<16x128xf32>
    tpu.vector_store %arg7[%c0_8, %c0_9], %10 {strides = array<i32>} : memref<16x128xf32, #tpu.memory_space<vmem>>, vector<16x128xf32>,
    return
  }
  func.func @transform_0(%arg0: i32, %arg1: i32) -> (i32, i32) {
    %c0_i32 = arith.constant 0 : i32
    %c0_i32_0 = arith.constant 0 : i32
    return %arg0, %c0_i32 : i32, i32
  }
  func.func @transform_1(%arg0: i32, %arg1: i32) -> (i32, i32) {
    %c0_i32 = arith.constant 0 : i32
    %c0_i32_0 = arith.constant 0 : i32
    %c0_i32_1 = arith.constant 0 : i32
    return %c0_i32, %c0_i32_0 : i32, i32
  }
  func.func @transform_2(%arg0: i32, %arg1: i32) -> (i32, i32) {
    %c0_i32 = arith.constant 0 : i32
    %c0_i32_0 = arith.constant 0 : i32
    %c0_i32_1 = arith.constant 0 : i32
    return %c0_i32, %c0_i32_0 : i32, i32
  }
  func.func @transform_3(%arg0: i32, %arg1: i32) -> (i32, i32) {
    %c0_i32 = arith.constant 0 : i32
    %c0_i32_0 = arith.constant 0 : i32
    return %c0_i32, %arg1 : i32, i32
  }
  func.func @transform_4(%arg0: i32, %arg1: i32) -> (i32, i32) {
    %c0_i32 = arith.constant 0 : i32
    %c0_i32_0 = arith.constant 0 : i32
    return %c0_i32, %arg1 : i32, i32
  }
  func.func @transform_5(%arg0: i32, %arg1: i32) -> (i32, i32) {
    %c0_i32 = arith.constant 0 : i32
    return %arg0, %arg1 : i32, i32
  }
}

module attributes {stable_mosaic.version = 11 : i64} {
  func.func @kernel(%arg0: i32, %arg1: i32, %arg2: memref<16x128xf32, #tpu.memory_space<vmem>>, %arg3: memref<1x128xf32, #tpu.memory_space<vmem>>, %arg4: memref<1x128xf32, #tpu.memory_space<vmem>>, %arg5: memref<128x128xbf16, #tpu.memory_space<vmem>>, %arg6: memref<1x128xf32, #tpu.memory_space<vmem>>, %arg7: memref<16x128xf32, #tpu.memory_space<vmem>>, %arg8: memref<16x128xbf16, #tpu.memory_space<vmem>>) attributes {dimension_semantics = [#tpu.dimension_semantics<parallel>, #tpu.dimension_semantics<arbitrary>], iteration_bounds = array<i64: 1, 1>, scalar_prefetch = 0 : i64, scratch_operands = 1 : i64, tpu.core_type = #tpu.core_type<tc>, window_params = [{transform_indices = @transform_0, window_bounds = array<i64: 16, 128>}, {pipeline_mode = #tpu.pipeline_mode<synchronous>, transform_indices = @transform_1, window_bounds = array<i64: 1, 128>}, {pipeline_mode = #tpu.pipeline_mode<synchronous>, transform_indices = @transform_2, window_bounds = array<i64: 1, 128>}, {transform_indices = @transform_3, window_bounds = array<i64: 128, 128>}, {transform_indices = @transform_4, window_bounds = array<i64: 1, 128>}, {transform_indices = @transform_5, window_bounds = array<i64: 16, 128>}]} {
    %c0_i32 = arith.constant 0 : i32
    %0 = arith.cmpi eq, %arg1, %c0_i32 : i32
    %1 = arith.extui %0 : i1 to i32
    %c0_i32_0 = arith.constant 0 : i32
    %2 = arith.cmpi ne, %1, %c0_i32_0 : i32
    scf.if %2 {
      %c0_10 = arith.constant 0 : index
      %c0_11 = arith.constant 0 : index
      %12 = vector.load %arg2[%c0_10, %c0_11] : memref<16x128xf32, #tpu.memory_space<vmem>>, vector<16x128xf32>
      %13 = tpu.iota {dimensions = array<i32: 1>} : vector<16x128xi32>
      %c32_i32 = arith.constant 32 : i32
      %14 = vector.broadcast %c32_i32 : i32 to vector<16x128xi32>
      %15 = arith.cmpi slt, %13, %14 : vector<16x128xi32>
      %cst_12 = arith.constant 0.000000e+00 : f32
      %16 = vector.broadcast %cst_12 : f32 to vector<16x128xf32>
      %17 = arith.select %15, %12, %16 : vector<16x128xi1>, vector<16x128xf32>
      %cst_13 = arith.constant dense<0.000000e+00> : vector<16xf32>
      %18 = vector.multi_reduction <add>, %17, %cst_13 [1] : vector<16x128xf32> to vector<16xf32>
      %19 = vector.shape_cast %18 : vector<16xf32> to vector<16x1xf32>
      %cst_14 = arith.constant 3.125000e-02 : f32
      %20 = vector.broadcast %cst_14 : f32 to vector<16x1xf32>
      %21 = arith.mulf %19, %20 : vector<16x1xf32>
      %22 = vector.broadcast %21 : vector<16x1xf32> to vector<16x128xf32>
      %23 = arith.subf %17, %22 : vector<16x128xf32>
      %cst_15 = arith.constant 0.000000e+00 : f32
      %24 = vector.broadcast %cst_15 : f32 to vector<16x128xf32>
      %25 = arith.select %15, %23, %24 : vector<16x128xi1>, vector<16x128xf32>
      %26 = arith.mulf %25, %25 : vector<16x128xf32>
      %cst_16 = arith.constant dense<0.000000e+00> : vector<16xf32>
      %27 = vector.multi_reduction <add>, %26, %cst_16 [1] : vector<16x128xf32> to vector<16xf32>
      %28 = vector.shape_cast %27 : vector<16xf32> to vector<16x1xf32>
      %cst_17 = arith.constant 3.125000e-02 : f32
      %29 = vector.broadcast %cst_17 : f32 to vector<16x1xf32>
      %30 = arith.mulf %28, %29 : vector<16x1xf32>
      %cst_18 = arith.constant 9.99999974E-6 : f32
      %31 = vector.broadcast %cst_18 : f32 to vector<16x1xf32>
      %32 = arith.addf %30, %31 : vector<16x1xf32>
      %33 = math.rsqrt %32 : vector<16x1xf32>
      %34 = vector.broadcast %33 : vector<16x1xf32> to vector<16x128xf32>
      %35 = arith.mulf %25, %34 : vector<16x128xf32>
      %c0_19 = arith.constant 0 : index
      %c0_20 = arith.constant 0 : index
      %36 = vector.load %arg3[%c0_19, %c0_20] : memref<1x128xf32, #tpu.memory_space<vmem>>, vector<1x128xf32>
      %37 = vector.broadcast %36 : vector<1x128xf32> to vector<16x128xf32>
      %38 = arith.mulf %35, %37 : vector<16x128xf32>
      %c0_21 = arith.constant 0 : index
      %c0_22 = arith.constant 0 : index
      %39 = vector.load %arg4[%c0_21, %c0_22] : memref<1x128xf32, #tpu.memory_space<vmem>>, vector<1x128xf32>
      %40 = vector.broadcast %39 : vector<1x128xf32> to vector<16x128xf32>
      %41 = arith.addf %38, %40 : vector<16x128xf32>
      %42 = arith.truncf %41 : vector<16x128xf32> to vector<16x128xbf16>
      %c0_23 = arith.constant 0 : index
      %c0_24 = arith.constant 0 : index
      %43 = vector.load %arg8[%c0_23, %c0_24] : memref<16x128xbf16, #tpu.memory_space<vmem>>, vector<16x128xbf16>
      tpu.vector_store %arg8[%c0_23, %c0_24], %42 {strides = array<i32>} : memref<16x128xbf16, #tpu.memory_space<vmem>>, vector<16x128xbf16>,
    } else {
    }
    %c0 = arith.constant 0 : index
    %c0_1 = arith.constant 0 : index
    %3 = vector.load %arg8[%c0, %c0_1] : memref<16x128xbf16, #tpu.memory_space<vmem>>, vector<16x128xbf16>
    %c0_2 = arith.constant 0 : index
    %c0_3 = arith.constant 0 : index
    %4 = vector.load %arg5[%c0_2, %c0_3] : memref<128x128xbf16, #tpu.memory_space<vmem>>, vector<128x128xbf16>
    %cst = arith.constant dense<0.000000e+00> : vector<16x128xf32>
    %5 = tpu.matmul %3, %4, %cst {dimension_numbers = #tpu.dot_dimension_numbers<[1], [0], [0], [1], [0, 0, 1, 1], [], []>} : vector<16x128xbf16>, vector<128x128xbf16>, vector<16x128xf32> -> vector<16x128xf32>
    %c0_4 = arith.constant 0 : index
    %c0_5 = arith.constant 0 : index
    %6 = vector.load %arg6[%c0_4, %c0_5] : memref<1x128xf32, #tpu.memory_space<vmem>>, vector<1x128xf32>
    %7 = vector.broadcast %6 : vector<1x128xf32> to vector<16x128xf32>
    %8 = arith.addf %5, %7 : vector<16x128xf32>
    %c0_6 = arith.constant 0 : index
    %c0_7 = arith.constant 0 : index
    %9 = vector.load %arg2[%c0_6, %c0_7] : memref<16x128xf32, #tpu.memory_space<vmem>>, vector<16x128xf32>
    %10 = arith.addf %8, %9 : vector<16x128xf32>
    %c0_8 = arith.constant 0 : index
    %c0_9 = arith.constant 0 : index
    %11 = vector.load %arg7[%c0_8, %c0_9] : memref<16x128xf32, #tpu.memory_space<vmem>>, vector<16x128xf32>
    tpu.vector_store %arg7[%c0_8, %c0_9], %10 {strides = array<i32>} : memref<16x128xf32, #tpu.memory_space<vmem>>, vector<16x128xf32>,
    return
  }
  func.func @transform_0(%arg0: i32, %arg1: i32) -> (i32, i32) {
    %c0_i32 = arith.constant 0 : i32
    %c0_i32_0 = arith.constant 0 : i32
    return %arg0, %c0_i32 : i32, i32
  }
  func.func @transform_1(%arg0: i32, %arg1: i32) -> (i32, i32) {
    %c0_i32 = arith.constant 0 : i32
    %c0_i32_0 = arith.constant 0 : i32
    %c0_i32_1 = arith.constant 0 : i32
    return %c0_i32, %c0_i32_0 : i32, i32
  }
  func.func @transform_2(%arg0: i32, %arg1: i32) -> (i32, i32) {
    %c0_i32 = arith.constant 0 : i32
    %c0_i32_0 = arith.constant 0 : i32
    %c0_i32_1 = arith.constant 0 : i32
    return %c0_i32, %c0_i32_0 : i32, i32
  }
  func.func @transform_3(%arg0: i32, %arg1: i32) -> (i32, i32) {
    %c0_i32 = arith.constant 0 : i32
    %c0_i32_0 = arith.constant 0 : i32
    return %c0_i32, %arg1 : i32, i32
  }
  func.func @transform_4(%arg0: i32, %arg1: i32) -> (i32, i32) {
    %c0_i32 = arith.constant 0 : i32
    %c0_i32_0 = arith.constant 0 : i32
    return %c0_i32, %arg1 : i32, i32
  }
  func.func @transform_5(%arg0: i32, %arg1: i32) -> (i32, i32) {
    %c0_i32 = arith.constant 0 : i32
    return %arg0, %arg1 : i32, i32
  }
}

</mosaic_0001>

<bundles_post_ra>
// kernel: tpu_custom_call.1
= control target key start
LH: loop header
LB: loop body
LE: loop exit
PB: predicated region body
PF: predicated region fallthrough
CT: control target
= control target key end

     0   :  { %10 = vsyncpa [#allocation4], 0  ;;  %s477_s0 = inlined_call_operand.hbm [shape: f32[16,128], index: 0, kind: input, shape index: {}]   ;;  %s478_s1 = inlined_call_operand.vmem [shape: f32[1,128], index: 1, kind: input, shape index: {}]   ;;  %s479_s2 = inlined_call_operand.vmem [shape: f32[1,128], index: 2, kind: input, shape index: {}]   ;;  %s480_s3 = inlined_call_operand.hbm [shape: bf16[128,128], index: 3, kind: input, shape index: {}]   ;;  %s481_s4 = inlined_call_operand.vmem [shape: f32[1,128], index: 4, kind: input, shape index: {}]   ;;  %s482_s5 = inlined_call_operand.hbm [shape: f32[16,128], index: 5, kind: output, shape index: {}]  }
   0x1   :  { %11 = vsyncpa [#allocation7], 0 }
   0x2   :  { %12 = vsyncpa [#allocation5], 0  ;;  %s375_s18 = smov [#allocation3]   ;;  %s303_s22 = scalar_lea.hbm %s477_s0, 256 }
   0x3   :  { %s18_s19 = sshll.u32 %s375_s18, 4  ;;  %p304_p0 = scmp.ne.s32.totalorder %s477_s0, %s303_s22  ;;  %s19_s19 = int_to_ptr.vmem [resolvable:$true] %s18_s19 }
   0x4   :  { %p307_p1 = scmp.lt.u32.totalorder %s303_s22, %s477_s0 }
   0x6   :  { %p309_p2 = pnand %p307_p1, %p304_p0 }
   0x8   :  { %312 = shalt.err (!%p309_p2)
}
   0x9   :  { %s313_s27 = scalar_lea.vmem %s19_s19, 256  ;;  %p318_p4 = scmp.lt.s32.totalorder %s19_s19, %s19_s19 }
   0xa   :  { %p314_p3 = scmp.ne.s32.totalorder %s19_s19, %s313_s27  ;;  %p319_p5 = scmp.lt.s32.totalorder %s313_s27, %s313_s27 }
   0xc   :  { %p320_p6 = por %p319_p5, %p318_p4 }
   0xe   :  { %p321_p7 = pnand %p320_p6, %p314_p3 }
  0x10   :  { %324 = shalt.err (!%p321_p7)
}
  0x11   :  { %s376_s28 = smov 128   ;;  %s377_s29 = smov 8  }
  0x12   :  { %24 = dma.hbm_to_vmem [thread:$0]  %s477_s0, 256, %s19_s19, [#allocation4], %s376_s28, %s376_s28, %s377_s29  }
  0x13   :  { %s378_s7 = smov [#allocation6]   ;;  %s325_s11 = scalar_lea.hbm %s480_s3, 1024 }
  0x14   :  { %s34_s8 = sshll.u32 %s378_s7, 4  ;;  %p326_p8 = scmp.ne.s32.totalorder %s480_s3, %s325_s11  ;;  %s35_s8 = int_to_ptr.vmem [resolvable:$true] %s34_s8 }
  0x15   :  { %p329_p9 = scmp.lt.u32.totalorder %s325_s11, %s480_s3 }
  0x17   :  { %p331_p10 = pnand %p329_p9, %p326_p8 }
  0x19   :  { %334 = shalt.err (!%p331_p10)
}
  0x1a   :  { %s335_s16 = scalar_lea.vmem %s35_s8, 1024  ;;  %p340_p12 = scmp.lt.s32.totalorder %s35_s8, %s35_s8 }
  0x1b   :  { %p336_p11 = scmp.ne.s32.totalorder %s35_s8, %s335_s16  ;;  %p341_p13 = scmp.lt.s32.totalorder %s335_s16, %s335_s16 }
  0x1d   :  { %p342_p0 = por %p341_p13, %p340_p12 }
  0x1f   :  { %p343_p1 = pnand %p342_p0, %p336_p11 }
  0x21   :  { %346 = shalt.err (!%p343_p1)
}
  0x22   :  { %s379_s0 = smov 64   ;;  %s380_s17 = smov 4  }
  0x23   :  { %40 = dma.hbm_to_vmem [thread:$0]  %s480_s3, 1024, %s35_s8, [#allocation7], %s379_s0, %s379_s0, %s380_s17  }
  0x24   :  { %369 = dma.done.wait [#allocation4], 256  }
  0x25   :  { %370 = vsyncadd [#allocation4], 4294967040 }
  0x26   :  { %371 = dma.done.wait [#allocation7], 1024  }
  0x27   :  { %372 = vsyncadd [#allocation7], 4294966272  ;;  %v56_v0 = vlaneseq  ;;  %v441_v2 = vld [vmem:[#allocation3] sm:$0xff]  ;;  %v443_v3 = vld [vmem:[#allocation3 + $0x8] sm:$0xff]  ;;  %v381_v7 = vmov 0.0   ;;  %vm382_vm1 = vmmov 0  }
  0x28   :  { %v291_v6 = vld [vmem:[#allocation6] sm:$0xff]   ;;  %262 = vmatprep.subr.bf16.mxu0 %v381_v7  ;;  %v292_v18 = vld [vmem:[#allocation6 + $0x8] sm:$0xff]   ;;  %v293_v19 = vld [vmem:[#allocation6 + $0x10] sm:$0xff]   ;;  %278 = vmatprep.mubr.msk.bf16.mxu0 %vm382_vm1, %v381_v7 }
  0x29   :  { %v57_v1 = vand.u32 127, %v56_v0  ;;  %263 = vmatpush3.bf16.msra.mxu0 %v291_v6  ;;  %v294_v20 = vld [vmem:[#allocation6 + $0x18] sm:$0xff]   ;;  %v295_v21 = vld [vmem:[#allocation6 + $0x20] sm:$0xff]   ;;  %v296_v22 = vld [vmem:[#allocation6 + $0x28] sm:$0xff]  }
  0x2a   :  { %264 = vmatprep.subr.bf16.mxu0 %v381_v7  ;;  %v297_v23 = vld [vmem:[#allocation6 + $0x30] sm:$0xff]   ;;  %v298_v24 = vld [vmem:[#allocation6 + $0x38] sm:$0xff]  }
  0x2b   :  { %vm58_vm0 = vcmp.lt.s32.totalorder %v57_v1, 32  ;;  %v242_v33 = vld [vmem:[%s478_s1] ss:$0 sm:$0xff]  ;;  %s383_s1 = smov [#allocation8]  }
  0x2c   :  { %v59_v4 = vsel %vm58_vm0, %v441_v2, 0.0  ;;  %v60_v5 = vsel %vm58_vm0, %v443_v3, 0.0  ;;  %v243_v37 = vld [vmem:[%s479_s2] ss:$0 sm:$0xff]  ;;  %s229_s25 = sshll.u32 %s383_s1, 4  ;;  %s230_s25 = int_to_ptr.vmem [resolvable:$true] %s229_s25 }
  0x2d   :  { %61 = vadd.xlane.f32.xlu0 %v59_v4  ;;  %265 = vmatpush3.bf16.msra.mxu0 %v292_v18  ;;  %v244_v42 = vld [vmem:[%s481_s4] ss:$0 sm:$0xff]  ;;  %s347_s2 = scalar_lea.vmem %s230_s25, 256  ;;  %p352_p3 = scmp.lt.s32.totalorder %s230_s25, %s230_s25 }
  0x2e   :  { %266 = vmatprep.subr.bf16.mxu0 %v381_v7  ;;  %p348_p2 = scmp.ne.s32.totalorder %s230_s25, %s347_s2  ;;  %p353_p4 = scmp.lt.s32.totalorder %s347_s2, %s347_s2 }
  0x30   :  { %p354_p5 = por %p353_p4, %p352_p3 }
  0x31   :  { %63 = vadd.xlane.f32.xlu0 %v60_v5  ;;  %267 = vmatpush3.bf16.msra.mxu0 %v293_v19 }
  0x32   :  { %268 = vmatprep.subr.bf16.mxu0 %v381_v7  ;;  %p355_p6 = pnand %p354_p5, %p348_p2 }
  0x35   :  { %269 = vmatpush3.bf16.msra.mxu0 %v294_v20 }
  0x36   :  { %270 = vmatprep.subr.bf16.mxu0 %v381_v7 }
  0x39   :  { %271 = vmatpush3.bf16.msra.mxu0 %v295_v21 }
  0x3a   :  { %272 = vmatprep.subr.bf16.mxu0 %v381_v7 }
  0x3d   :  { %273 = vmatpush3.bf16.msra.mxu0 %v296_v22 }
  0x3e   :  { %274 = vmatprep.subr.bf16.mxu0 %v381_v7 }
  0x41   :  { %275 = vmatpush3.bf16.msra.mxu0 %v297_v23 }
  0x42   :  { %276 = vmatprep.subr.bf16.mxu0 %v381_v7 }
  0x45   :  { %277 = vmatpush3.bf16.msra.mxu0 %v298_v24 }
  0xba   :  { %v62_v8 = vpop.xlane.xlu0 %61 }
  0xbb   :  { %v65_v9 = vmul.f32 0.03125, %v62_v8 }
  0xbd   :  { %v67_v10 = vsub.f32 %v59_v4, %v65_v9 }
  0xbe   :  { %v64_v11 = vpop.xlane.xlu0 %63 }
  0xbf   :  { %v66_v12 = vmul.f32 0.03125, %v64_v11  ;;  %v69_v13 = vsel %vm58_vm0, %v67_v10, 0.0 }
  0xc0   :  { %v71_v14 = vmul.f32 %v69_v13, %v69_v13 }
  0xc1   :  { %v68_v15 = vsub.f32 %v60_v5, %v66_v12 }
  0xc2   :  { %73 = vadd.xlane.f32.xlu1 %v71_v14 }
  0xc3   :  { %v70_v16 = vsel %vm58_vm0, %v68_v15, 0.0 }
  0xc4   :  { %v72_v17 = vmul.f32 %v70_v16, %v70_v16 }
  0xc6   :  { %75 = vadd.xlane.f32.xlu1 %v72_v17 }
 0x14f   :  { %v74_v25 = vpop.xlane.xlu1 %73 }
 0x150   :  { %v77_v26 = vmul.f32 0.03125, %v74_v25 }
 0x152   :  { %v79_v27 = vadd.f32 1e-05, %v77_v26 }
 0x153   :  { %v76_v28 = vpop.xlane.xlu1 %75 }
 0x154   :  { %299 = vrsqrt.f32 %v79_v27  ;;  %v78_v29 = vmul.f32 0.03125, %v76_v28 }
 0x156   :  { %v80_v30 = vadd.f32 1e-05, %v78_v29 }
 0x158   :  { %301 = vrsqrt.f32 %v80_v30 }
 0x15e   :  { %v300_v31 = vpop.eup %299 }
 0x15f   :  { %v83_v32 = vmul.f32 %v300_v31, %v69_v13 }
 0x161   :  { %v92_v36 = vmul.f32 %v242_v33, %v83_v32 }
 0x162   :  { %v302_v34 = vpop.eup %301 }
 0x163   :  { %v84_v35 = vmul.f32 %v302_v34, %v70_v16  ;;  %v101_v39 = vadd.f32 %v243_v37, %v92_v36 }
 0x165   :  { %v93_v38 = vmul.f32 %v242_v33, %v84_v35 }
 0x167   :  { %v102_v40 = vadd.f32 %v243_v37, %v93_v38 }
 0x169   :  { %v103_v41 = vpack.c.bf16 %v102_v40, %v101_v39 }
 0x16b   :  { %279 = vmatmul.mubr.bf16.vlgmr.msra.gmra.mrb[0].mxu0 %v103_v41 }
 0x23e   :  { %v211_v43 = vpop.f32.mrb[0].mxu0 }
 0x23f   :  { %v212_v44 = vadd.f32 %v244_v42, %v211_v43  ;;  %v280_v45 = vpop.f32.mrb[1].mxu0 }
 0x240   :  { %v214_v46 = vpop.f32.mrb[2].mxu0 }
 0x241   :  { %v220_v47 = vadd.f32 %v212_v44, %v441_v2  ;;  %v215_v48 = vadd.f32 %v244_v42, %v214_v46  ;;  %v281_v49 = vpop.f32.mrb[3].mxu0 }
 0x243   :  { %222 = vst [vmem:[#allocation8] sm:$0xff] %v220_v47  ;;  %v221_v50 = vadd.f32 %v215_v48, %v443_v3 }
 0x245   :  { %223 = vst [vmem:[#allocation8 + $0x8] sm:$0xff] %v221_v50 }
 0x246   :  { %358 = shalt.err (!%p355_p6)
}
 0x247   :  { %s359_s27 = scalar_lea.hbm %s482_s5, 256 }
 0x248   :  { %p360_p7 = scmp.ne.s32.totalorder %s482_s5, %s359_s27  ;;  %p363_p8 = scmp.lt.u32.totalorder %s359_s27, %s482_s5 }
 0x24a   :  { %p365_p9 = pnand %p363_p8, %p360_p7 }
 0x24c   :  { %368 = shalt.err (!%p365_p9)
}
 0x24d   :  { %235 = dma.vmem_to_hbm [thread:$0]  %s230_s25, 256, %s482_s5, [#allocation5], %s376_s28, %s376_s28, %s377_s29  }
 0x24e   :  { %373 = dma.done.wait [#allocation5], 256  }
 0x24f   :  { %374 = vsyncadd [#allocation5], 4294967040 }
 0x250   :  { %239 = vsyncpa [#allocation4], 1 }
 0x251   :  { %240 = vsyncpa [#allocation7], 1 }
 0x252   :  { %241 = vsyncpa [#allocation5], 1 }

// kernel: tpu_custom_call.1
= control target key start
LH: loop header
LB: loop body
LE: loop exit
PB: predicated region body
PF: predicated region fallthrough
CT: control target
= control target key end

     0   :  { %10 = vsyncpa [#allocation4], 0  ;;  %s477_s0 = inlined_call_operand.hbm [shape: f32[16,128], index: 0, kind: input, shape index: {}]   ;;  %s478_s1 = inlined_call_operand.vmem [shape: f32[1,128], index: 1, kind: input, shape index: {}]   ;;  %s479_s2 = inlined_call_operand.vmem [shape: f32[1,128], index: 2, kind: input, shape index: {}]   ;;  %s480_s3 = inlined_call_operand.hbm [shape: bf16[128,128], index: 3, kind: input, shape index: {}]   ;;  %s481_s4 = inlined_call_operand.vmem [shape: f32[1,128], index: 4, kind: input, shape index: {}]   ;;  %s482_s5 = inlined_call_operand.hbm [shape: f32[16,128], index: 5, kind: output, shape index: {}]  }
   0x1   :  { %11 = vsyncpa [#allocation7], 0 }
   0x2   :  { %12 = vsyncpa [#allocation5], 0  ;;  %s375_s18 = smov [#allocation3]   ;;  %s303_s22 = scalar_lea.hbm %s477_s0, 256 }
   0x3   :  { %s18_s19 = sshll.u32 %s375_s18, 4  ;;  %p304_p0 = scmp.ne.s32.totalorder %s477_s0, %s303_s22  ;;  %s19_s19 = int_to_ptr.vmem [resolvable:$true] %s18_s19 }
   0x4   :  { %p307_p1 = scmp.lt.u32.totalorder %s303_s22, %s477_s0 }
   0x6   :  { %p309_p2 = pnand %p307_p1, %p304_p0 }
   0x8   :  { %312 = shalt.err (!%p309_p2)
}
   0x9   :  { %s313_s27 = scalar_lea.vmem %s19_s19, 256  ;;  %p318_p4 = scmp.lt.s32.totalorder %s19_s19, %s19_s19 }
   0xa   :  { %p314_p3 = scmp.ne.s32.totalorder %s19_s19, %s313_s27  ;;  %p319_p5 = scmp.lt.s32.totalorder %s313_s27, %s313_s27 }
   0xc   :  { %p320_p6 = por %p319_p5, %p318_p4 }
   0xe   :  { %p321_p7 = pnand %p320_p6, %p314_p3 }
  0x10   :  { %324 = shalt.err (!%p321_p7)
}
  0x11   :  { %s376_s28 = smov 128   ;;  %s377_s29 = smov 8  }
  0x12   :  { %24 = dma.hbm_to_vmem [thread:$0]  %s477_s0, 256, %s19_s19, [#allocation4], %s376_s28, %s376_s28, %s377_s29  }
  0x13   :  { %s378_s7 = smov [#allocation6]   ;;  %s325_s11 = scalar_lea.hbm %s480_s3, 1024 }
  0x14   :  { %s34_s8 = sshll.u32 %s378_s7, 4  ;;  %p326_p8 = scmp.ne.s32.totalorder %s480_s3, %s325_s11  ;;  %s35_s8 = int_to_ptr.vmem [resolvable:$true] %s34_s8 }
  0x15   :  { %p329_p9 = scmp.lt.u32.totalorder %s325_s11, %s480_s3 }
  0x17   :  { %p331_p10 = pnand %p329_p9, %p326_p8 }
  0x19   :  { %334 = shalt.err (!%p331_p10)
}
  0x1a   :  { %s335_s16 = scalar_lea.vmem %s35_s8, 1024  ;;  %p340_p12 = scmp.lt.s32.totalorder %s35_s8, %s35_s8 }
  0x1b   :  { %p336_p11 = scmp.ne.s32.totalorder %s35_s8, %s335_s16  ;;  %p341_p13 = scmp.lt.s32.totalorder %s335_s16, %s335_s16 }
  0x1d   :  { %p342_p0 = por %p341_p13, %p340_p12 }
  0x1f   :  { %p343_p1 = pnand %p342_p0, %p336_p11 }
  0x21   :  { %346 = shalt.err (!%p343_p1)
}
  0x22   :  { %s379_s0 = smov 64   ;;  %s380_s17 = smov 4  }
  0x23   :  { %40 = dma.hbm_to_vmem [thread:$0]  %s480_s3, 1024, %s35_s8, [#allocation7], %s379_s0, %s379_s0, %s380_s17  }
  0x24   :  { %369 = dma.done.wait [#allocation4], 256  }
  0x25   :  { %370 = vsyncadd [#allocation4], 4294967040 }
  0x26   :  { %371 = dma.done.wait [#allocation7], 1024  }
  0x27   :  { %372 = vsyncadd [#allocation7], 4294966272  ;;  %v56_v0 = vlaneseq  ;;  %v441_v2 = vld [vmem:[#allocation3] sm:$0xff]  ;;  %v443_v3 = vld [vmem:[#allocation3 + $0x8] sm:$0xff]  ;;  %v381_v7 = vmov 0.0   ;;  %vm382_vm1 = vmmov 0  }
  0x28   :  { %v291_v6 = vld [vmem:[#allocation6] sm:$0xff]   ;;  %262 = vmatprep.subr.bf16.mxu0 %v381_v7  ;;  %v292_v18 = vld [vmem:[#allocation6 + $0x8] sm:$0xff]   ;;  %v293_v19 = vld [vmem:[#allocation6 + $0x10] sm:$0xff]   ;;  %278 = vmatprep.mubr.msk.bf16.mxu0 %vm382_vm1, %v381_v7 }
  0x29   :  { %v57_v1 = vand.u32 127, %v56_v0  ;;  %263 = vmatpush3.bf16.msra.mxu0 %v291_v6  ;;  %v294_v20 = vld [vmem:[#allocation6 + $0x18] sm:$0xff]   ;;  %v295_v21 = vld [vmem:[#allocation6 + $0x20] sm:$0xff]   ;;  %v296_v22 = vld [vmem:[#allocation6 + $0x28] sm:$0xff]  }
  0x2a   :  { %264 = vmatprep.subr.bf16.mxu0 %v381_v7  ;;  %v297_v23 = vld [vmem:[#allocation6 + $0x30] sm:$0xff]   ;;  %v298_v24 = vld [vmem:[#allocation6 + $0x38] sm:$0xff]  }
  0x2b   :  { %vm58_vm0 = vcmp.lt.s32.totalorder %v57_v1, 32  ;;  %v242_v33 = vld [vmem:[%s478_s1] ss:$0 sm:$0xff]  ;;  %s383_s1 = smov [#allocation8]  }
  0x2c   :  { %v59_v4 = vsel %vm58_vm0, %v441_v2, 0.0  ;;  %v60_v5 = vsel %vm58_vm0, %v443_v3, 0.0  ;;  %v243_v37 = vld [vmem:[%s479_s2] ss:$0 sm:$0xff]  ;;  %s229_s25 = sshll.u32 %s383_s1, 4  ;;  %s230_s25 = int_to_ptr.vmem [resolvable:$true] %s229_s25 }
  0x2d   :  { %61 = vadd.xlane.f32.xlu0 %v59_v4  ;;  %265 = vmatpush3.bf16.msra.mxu0 %v292_v18  ;;  %v244_v42 = vld [vmem:[%s481_s4] ss:$0 sm:$0xff]  ;;  %s347_s2 = scalar_lea.vmem %s230_s25, 256  ;;  %p352_p3 = scmp.lt.s32.totalorder %s230_s25, %s230_s25 }
  0x2e   :  { %266 = vmatprep.subr.bf16.mxu0 %v381_v7  ;;  %p348_p2 = scmp.ne.s32.totalorder %s230_s25, %s347_s2  ;;  %p353_p4 = scmp.lt.s32.totalorder %s347_s2, %s347_s2 }
  0x30   :  { %p354_p5 = por %p353_p4, %p352_p3 }
  0x31   :  { %63 = vadd.xlane.f32.xlu0 %v60_v5  ;;  %267 = vmatpush3.bf16.msra.mxu0 %v293_v19 }
  0x32   :  { %268 = vmatprep.subr.bf16.mxu0 %v381_v7  ;;  %p355_p6 = pnand %p354_p5, %p348_p2 }
  0x35   :  { %269 = vmatpush3.bf16.msra.mxu0 %v294_v20 }
  0x36   :  { %270 = vmatprep.subr.bf16.mxu0 %v381_v7 }
  0x39   :  { %271 = vmatpush3.bf16.msra.mxu0 %v295_v21 }
  0x3a   :  { %272 = vmatprep.subr.bf16.mxu0 %v381_v7 }
  0x3d   :  { %273 = vmatpush3.bf16.msra.mxu0 %v296_v22 }
  0x3e   :  { %274 = vmatprep.subr.bf16.mxu0 %v381_v7 }
  0x41   :  { %275 = vmatpush3.bf16.msra.mxu0 %v297_v23 }
  0x42   :  { %276 = vmatprep.subr.bf16.mxu0 %v381_v7 }
  0x45   :  { %277 = vmatpush3.bf16.msra.mxu0 %v298_v24 }
  0xba   :  { %v62_v8 = vpop.xlane.xlu0 %61 }
  0xbb   :  { %v65_v9 = vmul.f32 0.03125, %v62_v8 }
  0xbd   :  { %v67_v10 = vsub.f32 %v59_v4, %v65_v9 }
  0xbe   :  { %v64_v11 = vpop.xlane.xlu0 %63 }
  0xbf   :  { %v66_v12 = vmul.f32 0.03125, %v64_v11  ;;  %v69_v13 = vsel %vm58_vm0, %v67_v10, 0.0 }
  0xc0   :  { %v71_v14 = vmul.f32 %v69_v13, %v69_v13 }
  0xc1   :  { %v68_v15 = vsub.f32 %v60_v5, %v66_v12 }
  0xc2   :  { %73 = vadd.xlane.f32.xlu1 %v71_v14 }
  0xc3   :  { %v70_v16 = vsel %vm58_vm0, %v68_v15, 0.0 }
  0xc4   :  { %v72_v17 = vmul.f32 %v70_v16, %v70_v16 }
  0xc6   :  { %75 = vadd.xlane.f32.xlu1 %v72_v17 }
 0x14f   :  { %v74_v25 = vpop.xlane.xlu1 %73 }
 0x150   :  { %v77_v26 = vmul.f32 0.03125, %v74_v25 }
 0x152   :  { %v79_v27 = vadd.f32 1e-05, %v77_v26 }
 0x153   :  { %v76_v28 = vpop.xlane.xlu1 %75 }
 0x154   :  { %299 = vrsqrt.f32 %v79_v27  ;;  %v78_v29 = vmul.f32 0.03125, %v76_v28 }
 0x156   :  { %v80_v30 = vadd.f32 1e-05, %v78_v29 }
 0x158   :  { %301 = vrsqrt.f32 %v80_v30 }
 0x15e   :  { %v300_v31 = vpop.eup %299 }
 0x15f   :  { %v83_v32 = vmul.f32 %v300_v31, %v69_v13 }
 0x161   :  { %v92_v36 = vmul.f32 %v242_v33, %v83_v32 }
 0x162   :  { %v302_v34 = vpop.eup %301 }
 0x163   :  { %v84_v35 = vmul.f32 %v302_v34, %v70_v16  ;;  %v101_v39 = vadd.f32 %v243_v37, %v92_v36 }
 0x165   :  { %v93_v38 = vmul.f32 %v242_v33, %v84_v35 }
 0x167   :  { %v102_v40 = vadd.f32 %v243_v37, %v93_v38 }
 0x169   :  { %v103_v41 = vpack.c.bf16 %v102_v40, %v101_v39 }
 0x16b   :  { %279 = vmatmul.mubr.bf16.vlgmr.msra.gmra.mrb[0].mxu0 %v103_v41 }
 0x23e   :  { %v211_v43 = vpop.f32.mrb[0].mxu0 }
 0x23f   :  { %v212_v44 = vadd.f32 %v244_v42, %v211_v43  ;;  %v280_v45 = vpop.f32.mrb[1].mxu0 }
 0x240   :  { %v214_v46 = vpop.f32.mrb[2].mxu0 }
 0x241   :  { %v220_v47 = vadd.f32 %v212_v44, %v441_v2  ;;  %v215_v48 = vadd.f32 %v244_v42, %v214_v46  ;;  %v281_v49 = vpop.f32.mrb[3].mxu0 }
 0x243   :  { %222 = vst [vmem:[#allocation8] sm:$0xff] %v220_v47  ;;  %v221_v50 = vadd.f32 %v215_v48, %v443_v3 }
 0x245   :  { %223 = vst [vmem:[#allocation8 + $0x8] sm:$0xff] %v221_v50 }
 0x246   :  { %358 = shalt.err (!%p355_p6)
}
 0x247   :  { %s359_s27 = scalar_lea.hbm %s482_s5, 256 }
 0x248   :  { %p360_p7 = scmp.ne.s32.totalorder %s482_s5, %s359_s27  ;;  %p363_p8 = scmp.lt.u32.totalorder %s359_s27, %s482_s5 }
 0x24a   :  { %p365_p9 = pnand %p363_p8, %p360_p7 }
 0x24c   :  { %368 = shalt.err (!%p365_p9)
}
 0x24d   :  { %235 = dma.vmem_to_hbm [thread:$0]  %s230_s25, 256, %s482_s5, [#allocation5], %s376_s28, %s376_s28, %s377_s29  }
 0x24e   :  { %373 = dma.done.wait [#allocation5], 256  }
 0x24f   :  { %374 = vsyncadd [#allocation5], 4294967040 }
 0x250   :  { %239 = vsyncpa [#allocation4], 1 }
 0x251   :  { %240 = vsyncpa [#allocation7], 1 }
 0x252   :  { %241 = vsyncpa [#allocation5], 1 }

</bundles_post_ra>
